<compile_context>
chip_gen: v5e
topology: v5e:2x2
jax: 0.10.0
libtpu: 0.0.40
codegen_flags: <defaults>
</compile_context>

<pallas_src>
import jax
import jax.numpy as jnp
from jax.experimental import pallas as pl
from jax.experimental.pallas import tpu as pltpu


_MAX_DMA_CHUNKS = 4
_CHUNK_THRESHOLD_BYTES = 8 << 20  # only bother chunking for >= 8 MiB arrays


def _make_dma_copy_kernel(chunk_bounds):
    """Kernel factory: direct HBM->HBM DMA copy over static chunk bounds.

    chunk_bounds: list of (start, size) along axis 0; (0, None) means
    whole-array copy (used for 0-d arrays / small inputs).
    """

    def kernel(x_hbm, o_hbm, sems):
        copies = []
        for idx, (start, size) in enumerate(chunk_bounds):
            if size is None:
                src, dst = x_hbm, o_hbm
            else:
                src = x_hbm.at[pl.ds(start, size)]
                dst = o_hbm.at[pl.ds(start, size)]
            copies.append(pltpu.make_async_copy(src, dst, sems.at[idx]))
        # Start every chunk before waiting on any -> concurrent DMAs.
        for cp in copies:
            cp.start()
        for cp in copies:
            cp.wait()

    return kernel


def _materialized_copy(x):
    """Pallas copy that materializes a fresh buffer equal to x (any shape)."""
    nbytes = x.size * jnp.dtype(x.dtype).itemsize

    if x.ndim >= 1 and x.shape[0] >= 2 and nbytes >= _CHUNK_THRESHOLD_BYTES:
        n_chunks = min(_MAX_DMA_CHUNKS, x.shape[0])
        base, rem = divmod(x.shape[0], n_chunks)
        chunk_bounds = []
        start = 0
        for i in range(n_chunks):
            size = base + (1 if i < rem else 0)
            chunk_bounds.append((start, size))
            start += size
    else:
        chunk_bounds = [(0, None)]  # single whole-array DMA

    return pl.pallas_call(
        _make_dma_copy_kernel(chunk_bounds),
        out_shape=jax.ShapeDtypeStruct(x.shape, x.dtype),
        in_specs=[pl.BlockSpec(memory_space=pl.ANY)],
        out_specs=pl.BlockSpec(memory_space=pl.ANY),
        scratch_shapes=[pltpu.SemaphoreType.DMA((len(chunk_bounds),))],
        compiler_params=pltpu.CompilerParams(has_side_effects=True),
    )(x)


def identity(x, *, force_copy=False):
    """Identity forward pass: returns x.

    By default this is a true no-op (returns x, zero HBM traffic), matching
    the PyTorch module's semantics.  Pass force_copy=True to materialize a
    fresh buffer via a direct HBM->HBM DMA Pallas kernel.
    """
    if not force_copy:
        return x
    if x.size == 0:
        return x  # nothing to copy
    return _materialized_copy(x)


if __name__ == "__main__":
    key = jax.random.PRNGKey(0)
    # Small NCHW-style input consistent with typical module usage.
    x = jax.random.normal(key, (2, 4, 16, 16), dtype=jnp.float32)

    # Default path: semantic no-op, just returns x.
    y_default = identity(x)
    assert y_default is x

    # Forced-copy path: exercises the Pallas HBM->HBM DMA kernel.
    y = identity(x, force_copy=True)
    y = jax.block_until_ready(y)

    assert y.shape == x.shape and y.dtype == x.dtype
    assert bool(jnp.all(y == x))
    print("KERNEL_OK")
</pallas_src>

<mosaic_0001>
module attributes {stable_mosaic.version = 11 : i64} {
  func.func @kernel(%arg0: memref<2x4x16x16xf32, #tpu.memory_space<any>>, %arg1: memref<2x4x16x16xf32, #tpu.memory_space<any>>, %arg2: memref<1x!tpu.dma_semaphore, #tpu.memory_space<semaphore_mem>>) attributes {dimension_semantics = [], scalar_prefetch = 0 : i64, scratch_operands = 1 : i64, tpu.core_type = #tpu.core_type<tc>} {
    %c0_i32 = arith.constant 0 : i32
    %0 = tpu.memref_slice %arg2[%c0_i32] : memref<1x!tpu.dma_semaphore, #tpu.memory_space<semaphore_mem>> -> memref<1x!tpu.dma_semaphore, #tpu.memory_space<semaphore_mem>>
    %1 = tpu.memref_squeeze %0 : memref<1x!tpu.dma_semaphore, #tpu.memory_space<semaphore_mem>> -> memref<!tpu.dma_semaphore, #tpu.memory_space<semaphore_mem>>
    tpu.enqueue_dma source(%arg0 : memref<2x4x16x16xf32, #tpu.memory_space<any>>) target(%arg1 : memref<2x4x16x16xf32, #tpu.memory_space<any>>) target_semaphore(%1 : memref<!tpu.dma_semaphore, #tpu.memory_space<semaphore_mem>>)
    %c0_i32_0 = arith.constant 0 : i32
    %2 = tpu.memref_slice %arg2[%c0_i32_0] : memref<1x!tpu.dma_semaphore, #tpu.memory_space<semaphore_mem>> -> memref<1x!tpu.dma_semaphore, #tpu.memory_space<semaphore_mem>>
    %3 = tpu.memref_squeeze %2 : memref<1x!tpu.dma_semaphore, #tpu.memory_space<semaphore_mem>> -> memref<!tpu.dma_semaphore, #tpu.memory_space<semaphore_mem>>
    tpu.wait_dma2 semaphore(%3 : memref<!tpu.dma_semaphore, #tpu.memory_space<semaphore_mem>>) src(%arg0 : memref<2x4x16x16xf32, #tpu.memory_space<any>>) dst(%arg1 : memref<2x4x16x16xf32, #tpu.memory_space<any>>)
    return
  }
}

</mosaic_0001>

<bundles_post_ra>
// kernel: tpu_custom_call.1
= control target key start
LH: loop header
LB: loop body
LE: loop exit
PB: predicated region body
PF: predicated region fallthrough
CT: control target
= control target key end

     0   :  { %s34_s12 = smov [#allocation2]   ;;  %s35_s13 = smov [#allocation3]   ;;  %s53_s0 = inlined_call_operand.hbm [shape: f32[2,4,16,16], index: 0, kind: input, shape index: {}]   ;;  %s54_s1 = inlined_call_operand.hbm [shape: f32[2,4,16,16], index: 1, kind: output, shape index: {}]  }
   0x1   :  { %s10_s8 = sshll.u32 %s53_s0, 4  ;;  %s12_s11 = sshll.u32 %s54_s1, 4  ;;  %s11_s8 = int_to_ptr.hbm [resolvable:$true] %s10_s8  ;;  %s13_s11 = int_to_ptr.hbm [resolvable:$true] %s12_s11 }
   0x2   :  { %s36_s14 = smov 0  }
   0x3   :  { %16 = dma.general %s11_s8, 2048, %s13_s11, %s34_s12, %s35_s13, [#allocation4], %s36_s14, 0  }
   0x4   :  { %32 = dma.done.wait [#allocation2], 2048 }
   0x5   :  { %33 = vsyncadd [#allocation2], 4294965248 }
   0x6   :  { %22 = vsyncmov [#allocation2] }
   0x9   :  { %s23_s15 = vpop.sfrf %22 }
   0xa   :  { %p28_p0 = scmp.ne.s32.totalorder %s23_s15, 0 }
   0xc   :  { %27 = shalt.err (%p28_p0)  }

</bundles_post_ra>
